<compile_context>
chip_gen: v7x
topology: tpu7x:2x2x1
jax: 0.10.0
libtpu: 0.0.40
codegen_flags: <defaults>
</compile_context>

<pallas_src>
import functools

import jax
import jax.numpy as jnp
from jax.experimental import pallas as pl
from jax.experimental.pallas import tpu as pltpu

LANE = 128  # TPU vreg lane width


def _linear_softmax_kernel(x_ref, w_ref, b_ref, o_ref):
    # x_ref: (B, IN), w_ref: (IN, OUT_PAD), b_ref: (1, OUT_PAD), o_ref: (B, OUT_PAD)
    logits = jnp.dot(x_ref[...], w_ref[...],
                     preferred_element_type=jnp.float32) + b_ref[...]
    # Numerically stable softmax along dim=-1 (padded cols are -inf -> exp()=0)
    m = jnp.max(logits, axis=-1, keepdims=True)
    e = jnp.exp(logits - m)
    denom = jnp.sum(e, axis=-1, keepdims=True)
    o_ref[...] = (e * pl.reciprocal(denom, approx=False)).astype(o_ref.dtype)


def prepare_params(weight, bias):
    """One-time parameter prep (at init, NOT per forward call).

    weight: (out_size, in_size)  PyTorch nn.Linear layout
    bias:   (out_size,)
    Returns:
      w_t : (in_size, out_pad)  transposed + lane-padded with zeros
      b2d : (1, out_pad)        lane-padded with -inf (so softmax is unchanged)
    """
    out_size, in_size = weight.shape
    out_pad = pl.cdiv(out_size, LANE) * LANE
    w_t = jnp.zeros((in_size, out_pad), weight.dtype).at[:, :out_size].set(weight.T)
    b2d = jnp.full((1, out_pad), -jnp.inf, bias.dtype).at[0, :out_size].set(bias)
    return w_t, b2d


@functools.partial(jax.jit, static_argnames=("out_size", "block_batch"))
def linear_policy_nn(x, w_t, b2d, *, out_size, block_batch=1024):
    """Forward pass of LinearPolicyNN: softmax(x @ W^T + b, axis=-1).

    x:   (batch, in_size) f32
    w_t: (in_size, out_pad) prepared weight (see prepare_params)
    b2d: (1, out_pad) prepared bias
    Returns (batch, out_size) probabilities.
    """
    batch, in_size = x.shape
    out_pad = w_t.shape[1]

    cost = pl.CostEstimate(
        flops=2 * batch * in_size * out_pad + 6 * batch * out_pad,
        transcendentals=batch * out_pad,
        bytes_accessed=4 * (x.size + w_t.size + b2d.size + batch * out_pad),
    )

    if batch <= block_batch:
        # Small batch: single VMEM-resident block, no grid / no pipeline.
        out_padded = pl.pallas_call(
            _linear_softmax_kernel,
            out_shape=jax.ShapeDtypeStruct((batch, out_pad), x.dtype),
            in_specs=[
                pl.BlockSpec(memory_space=pltpu.MemorySpace.VMEM),
                pl.BlockSpec(memory_space=pltpu.MemorySpace.VMEM),
                pl.BlockSpec(memory_space=pltpu.MemorySpace.VMEM),
            ],
            out_specs=pl.BlockSpec(memory_space=pltpu.MemorySpace.VMEM),
            cost_estimate=cost,
        )(x, w_t, b2d)
    else:
        # Large batch: tile the batch axis; W / bias stay VMEM-resident
        # across grid steps; "parallel" shards across TCs on v7x.
        tb = block_batch
        out_padded = pl.pallas_call(
            _linear_softmax_kernel,
            out_shape=jax.ShapeDtypeStruct((batch, out_pad), x.dtype),
            grid=(pl.cdiv(batch, tb),),
            in_specs=[
                pl.BlockSpec((tb, in_size), lambda i: (i, 0)),
                pl.BlockSpec((in_size, out_pad), lambda i: (0, 0)),
                pl.BlockSpec((1, out_pad), lambda i: (0, 0)),
            ],
            out_specs=pl.BlockSpec((tb, out_pad), lambda i: (i, 0)),
            compiler_params=pltpu.CompilerParams(
                dimension_semantics=("parallel",)
            ),
            cost_estimate=cost,
        )(x, w_t, b2d)

    # Drop the lane padding (cheap slice; or keep the padded slab downstream).
    return out_padded[:, :out_size]


if __name__ == "__main__":
    in_size, out_size = 32, 16

    key = jax.random.PRNGKey(0)
    kx, kw, kb, kx2 = jax.random.split(key, 4)

    # PyTorch-style uniform(-1/sqrt(in), 1/sqrt(in)) init
    bound = 1.0 / jnp.sqrt(jnp.float32(in_size))
    weight = jax.random.uniform(kw, (out_size, in_size), jnp.float32, -bound, bound)
    bias = jax.random.uniform(kb, (out_size,), jnp.float32, -bound, bound)

    # One-time parameter prep (transpose + lane-pad), done at "init"
    w_t, b2d = prepare_params(weight, bias)

    # --- small batch: no-grid single-block path ---
    batch = 8
    x = jax.random.normal(kx, (batch, in_size), jnp.float32)
    out = jax.block_until_ready(linear_policy_nn(x, w_t, b2d, out_size=out_size))

    ref = jax.nn.softmax(x @ weight.T + bias, axis=-1)
    assert out.shape == (batch, out_size)
    assert jnp.allclose(out, ref, atol=1e-5, rtol=1e-5), "mismatch vs reference (small batch)"
    assert jnp.allclose(jnp.sum(out, axis=-1), 1.0, atol=1e-5), "rows must sum to 1"

    # --- larger batch: batch-tiled path with VMEM-resident weights ---
    batch2 = 2048
    x2 = jax.random.normal(kx2, (batch2, in_size), jnp.float32)
    out2 = jax.block_until_ready(
        linear_policy_nn(x2, w_t, b2d, out_size=out_size, block_batch=512))

    ref2 = jax.nn.softmax(x2 @ weight.T + bias, axis=-1)
    assert out2.shape == (batch2, out_size)
    assert jnp.allclose(out2, ref2, atol=1e-5, rtol=1e-5), "mismatch vs reference (tiled batch)"
    assert jnp.allclose(jnp.sum(out2, axis=-1), 1.0, atol=1e-5), "rows must sum to 1"

    print("KERNEL_OK")
</pallas_src>

<mosaic_0001>
module attributes {stable_mosaic.version = 11 : i64} {
  func.func @_linear_softmax_kernel(%arg0: memref<8x32xf32, #tpu.memory_space<vmem>>, %arg1: memref<32x128xf32, #tpu.memory_space<vmem>>, %arg2: memref<1x128xf32, #tpu.memory_space<vmem>>, %arg3: memref<8x128xf32, #tpu.memory_space<vmem>>) attributes {dimension_semantics = [], scalar_prefetch = 0 : i64, scratch_operands = 0 : i64, tpu.core_type = #tpu.core_type<tc>} {
    %c0 = arith.constant 0 : index
    %c0_0 = arith.constant 0 : index
    %0 = vector.load %arg0[%c0, %c0_0] : memref<8x32xf32, #tpu.memory_space<vmem>>, vector<8x32xf32>
    %c0_1 = arith.constant 0 : index
    %c0_2 = arith.constant 0 : index
    %1 = vector.load %arg1[%c0_1, %c0_2] : memref<32x128xf32, #tpu.memory_space<vmem>>, vector<32x128xf32>
    %cst = arith.constant dense<0.000000e+00> : vector<8x128xf32>
    %2 = tpu.matmul %0, %1, %cst {dimension_numbers = #tpu.dot_dimension_numbers<[1], [0], [0], [1], [0, 0, 1, 1], [], []>} : vector<8x32xf32>, vector<32x128xf32>, vector<8x128xf32> -> vector<8x128xf32>
    %c0_3 = arith.constant 0 : index
    %c0_4 = arith.constant 0 : index
    %3 = vector.load %arg2[%c0_3, %c0_4] : memref<1x128xf32, #tpu.memory_space<vmem>>, vector<1x128xf32>
    %4 = vector.broadcast %3 : vector<1x128xf32> to vector<8x128xf32>
    %5 = arith.addf %2, %4 : vector<8x128xf32>
    %cst_5 = arith.constant dense<0xFF800000> : vector<8xf32>
    %6 = vector.multi_reduction <maximumf>, %5, %cst_5 [1] : vector<8x128xf32> to vector<8xf32>
    %7 = vector.shape_cast %6 : vector<8xf32> to vector<8x1xf32>
    %8 = vector.broadcast %7 : vector<8x1xf32> to vector<8x128xf32>
    %9 = arith.subf %5, %8 : vector<8x128xf32>
    %10 = math.exp %9 : vector<8x128xf32>
    %cst_6 = arith.constant dense<0.000000e+00> : vector<8xf32>
    %11 = vector.multi_reduction <add>, %10, %cst_6 [1] : vector<8x128xf32> to vector<8xf32>
    %12 = vector.shape_cast %11 : vector<8xf32> to vector<8x1xf32>
    %13 = tpu.reciprocal %12 : vector<8x1xf32> -> vector<8x1xf32>
    %14 = vector.broadcast %13 : vector<8x1xf32> to vector<8x128xf32>
    %15 = arith.mulf %10, %14 : vector<8x128xf32>
    %c0_7 = arith.constant 0 : index
    %c0_8 = arith.constant 0 : index
    %16 = vector.load %arg3[%c0_7, %c0_8] : memref<8x128xf32, #tpu.memory_space<vmem>>, vector<8x128xf32>
    tpu.vector_store %arg3[%c0_7, %c0_8], %15 {strides = array<i32>} : memref<8x128xf32, #tpu.memory_space<vmem>>, vector<8x128xf32>,
    return
  }
}

</mosaic_0001>

<bundles_post_ra>
// kernel: linear_policy_nn.1
= control target key start
LH: loop header
LB: loop body
LE: loop exit
PB: predicated region body
PF: predicated region fallthrough
CT: control target
= control target key end

     0   :  { %8 = vsyncpa [#allocation3], 0  ;;  %s335_s0 = inlined_call_operand.hbm [shape: f32[8,32], index: 0, kind: input, shape index: {}]   ;;  %s336_s1 = inlined_call_operand.hbm [shape: f32[32,128], index: 1, kind: input, shape index: {}]   ;;  %s337_s2 = inlined_call_operand.vmem [shape: f32[1,128], index: 2, kind: input, shape index: {}]   ;;  %s338_s3 = inlined_call_operand.hbm [shape: f32[8,128], index: 3, kind: output, shape index: {}]  }
   0x1   :  { %9 = vsyncpa [#allocation6], 0 }
   0x2   :  { %10 = vsyncpa [#allocation4], 0  ;;  %s261_s12 = smov [#allocation2]   ;;  %s262_s14 = smov [#allocation5]  }
   0x3   :  { %s17_s13 = sshll.u32 %s261_s12, 4  ;;  %s26_s15 = sshll.u32 %s262_s14, 4  ;;  %s18_s13 = int_to_ptr.vmem [resolvable:$true] %s17_s13  ;;  %s289_s15 = int_to_ptr.vmem [resolvable:$true] %s26_s15 }
   0x4   :  { %s189_s18 = scalar_lea.hbm %s335_s0, 128 }
   0x5   :  { %p190_p0 = scmp.ne.s32.totalorder %s335_s0, %s189_s18  ;;  %p193_p1 = scmp.lt.u32.totalorder %s189_s18, %s335_s0 }
   0x7   :  { %p195_p2 = pnand %p193_p1, %p190_p0 }
   0x9   :  { %198 = shalt.err (!%p195_p2)
}
   0xa   :  { %s199_s23 = scalar_lea.vmem %s18_s13, 128  ;;  %p204_p4 = scmp.lt.s32.totalorder %s18_s13, %s18_s13 }
   0xb   :  { %p200_p3 = scmp.ne.s32.totalorder %s18_s13, %s199_s23  ;;  %p205_p5 = scmp.lt.s32.totalorder %s199_s23, %s199_s23 }
   0xd   :  { %p206_p6 = por %p205_p5, %p204_p4 }
   0xf   :  { %p207_p7 = pnand %p206_p6, %p200_p3 }
  0x11   :  { %210 = shalt.err (!%p207_p7)
}
  0x12   :  { %20 = dma.hbm_to_vmem [thread:$0]  %s335_s0, 128, %s18_s13, [#allocation3]  }
  0x13   :  { %s211_s28 = scalar_lea.hbm %s336_s1, 512 }
  0x14   :  { %p212_p8 = scmp.ne.s32.totalorder %s336_s1, %s211_s28  ;;  %p215_p9 = scmp.lt.u32.totalorder %s211_s28, %s336_s1 }
  0x16   :  { %p217_p10 = pnand %p215_p9, %p212_p8 }
  0x18   :  { %220 = shalt.err (!%p217_p10)
}
  0x19   :  { %s221_s6 = scalar_lea.vmem %s289_s15, 512  ;;  %p226_p12 = scmp.lt.s32.totalorder %s289_s15, %s289_s15 }
  0x1a   :  { %p222_p11 = scmp.ne.s32.totalorder %s289_s15, %s221_s6  ;;  %p227_p13 = scmp.lt.s32.totalorder %s221_s6, %s221_s6 }
  0x1c   :  { %p228_p0 = por %p227_p13, %p226_p12 }
  0x1e   :  { %p229_p1 = pnand %p228_p0, %p222_p11 }
  0x20   :  { %232 = shalt.err (!%p229_p1)
}
  0x21   :  { %s263_s0 = smov 128   ;;  %s264_s7 = smov 8  }
  0x22   :  { %32 = dma.hbm_to_vmem [thread:$0]  %s336_s1, 512, %s289_s15, [#allocation6], %s263_s0, %s263_s0, %s264_s7  }
  0x23   :  { %255 = dma.done.wait [#allocation3], 128  }
  0x24   :  { %256 = vsyncadd [#allocation3], 4294967168 }
  0x25   :  { %257 = dma.done.wait [#allocation6], 512  }
  0x26   :  { %258 = vsyncadd [#allocation6], 4294966784  ;;  %v265_v0 = vmov 0.0|0.0   ;;  %vm266_vm0 = vmmov 0   ;;  %v267_v1 = vmov 0.0   ;;  %v42_v2 = vld [vmem:[#allocation5] sm:$0xff] }
  0x27   :  { %171 = vmatprep.subr.bf16.mxu0 %v265_v0  ;;  %168 = vmatprep.mubr.msk.f32.mxu0 %vm266_vm0, %v267_v1  ;;  %v43_v3 = vld [vmem:[#allocation5 + $0x8] sm:$0xff]  ;;  %v44_v4 = vld [vmem:[#allocation5 + $0x10] sm:$0xff]  ;;  %v45_v6 = vld [vmem:[#allocation5 + $0x18] sm:$0xff]  ;;  %vm53_vm1 = vcmask 261120   ;;  %s268_s11 = smov [#allocation7]  }
  0x28   :  { %v172_v5 = vpack.c.bf16 %v43_v3, %v42_v2  ;;  %v175_v7 = vpack.c.bf16 %v45_v6, %v44_v4  ;;  %v41_v8 = vld [vmem:[#allocation2] sm:$0xff]  ;;  %s143_s12 = sshll.u32 %s268_s11, 4  ;;  %s144_s12 = int_to_ptr.vmem [resolvable:$true] %s143_s12 }
  0x29   :  { %v153_v9 = vld [vmem:[%s337_s2] ss:$0 sm:$0xff]  ;;  %s233_s13 = scalar_lea.vmem %s144_s12, 128  ;;  %p238_p3 = scmp.lt.s32.totalorder %s144_s12, %s144_s12 }
  0x2a   :  { %173 = vmatpush3.bf16.msra.mxu0 %v172_v5  ;;  %p234_p2 = scmp.ne.s32.totalorder %s144_s12, %s233_s13  ;;  %p239_p4 = scmp.lt.s32.totalorder %s233_s13, %s233_s13 }
  0x2b   :  { %174 = vmatprep.subr.bf16.mxu0 %v265_v0 }
  0x2c   :  { %p240_p5 = por %p239_p4, %p238_p3 }
  0x2e   :  { %176 = vmatpush3.bf16.msra.mxu0 %v175_v7  ;;  %p241_p6 = pnand %p240_p5, %p234_p2 }
  0x31   :  { %169 = vmatmul.mubr.msk.f32.vlgmr.msra.gmra.mrb[0].mxu0 %vm53_vm1, %v41_v8 }
 0x104   :  { %v123_v10 = vpop.f32.mrb[0].mxu0 }
 0x105   :  { %v124_v11 = vadd.f32 %v153_v9, %v123_v10  ;;  %v170_v12 = vpop.f32.mrb[1].mxu0 }
 0x107   :  { %127 = vmax.xlane.f32.xlu0 %v124_v11 }
 0x194   :  { %v128_v13 = vpop.xlane.xlu0 %127 }
 0x195   :  { %v129_v14 = vsub.f32 %v124_v11, %v128_v13 }
 0x197   :  { %v130_v15 = vmul.f32 1.442695, %v129_v14 }
 0x199   :  { %185 = vpow2.f32 %v130_v15 }
 0x1a3   :  { %v186_v16 = vpop.eup %185 }
 0x1a4   :  { %132 = vadd.xlane.f32.xlu0 %v186_v16 }
 0x231   :  { %v133_v17 = vpop.xlane.xlu0 %132 }
 0x232   :  { %187 = vrcp.f32 %v133_v17 }
 0x23c   :  { %v188_v18 = vpop.eup %187 }
 0x23d   :  { %v135_v19 = vmul.f32 %v188_v18, %v186_v16 }
 0x23f   :  { %136 = vst [vmem:[#allocation7] sm:$0xff] %v135_v19 }
 0x240   :  { %244 = shalt.err (!%p241_p6)
}
 0x241   :  { %s245_s15 = scalar_lea.hbm %s338_s3, 128 }
 0x242   :  { %p246_p7 = scmp.ne.s32.totalorder %s338_s3, %s245_s15  ;;  %p249_p8 = scmp.lt.u32.totalorder %s245_s15, %s338_s3 }
 0x244   :  { %p251_p9 = pnand %p249_p8, %p246_p7 }
 0x246   :  { %254 = shalt.err (!%p251_p9)
}
 0x247   :  { %146 = dma.vmem_to_hbm [thread:$0]  %s144_s12, 128, %s338_s3, [#allocation4]  }
 0x248   :  { %259 = dma.done.wait [#allocation4], 128  }
 0x249   :  { %260 = vsyncadd [#allocation4], 4294967168 }
 0x24a   :  { %150 = vsyncpa [#allocation3], 1 }
 0x24b   :  { %151 = vsyncpa [#allocation6], 1 }
 0x24c   :  { %152 = vsyncpa [#allocation4], 1 }

</bundles_post_ra>
